<compile_context>
chip_gen: v5e
topology: v5e:2x2
jax: 0.10.0
libtpu: 0.0.40
codegen_flags: <defaults>
</compile_context>

<pallas_src>
import jax
import jax.numpy as jnp
from jax.experimental import pallas as pl
from jax.experimental.pallas import tpu as pltpu

_HIDDEN = 128   # hidden width of nn.Linear(4, 128)
_K_PAD = 8      # 4 input features zero-padded to 8 (sublane-aligned contraction)
_OUT_SUB = 8    # fused head rows: 0 = a0-a1 (folded), 2 = value, rest exactly 0


def _fused_network_kernel(x_ref, w1_ref, b1_ref, wh_ref, bh_ref, out_ref):
    """One batch tile, feature-major layout (batch on lanes).

    x_ref  : (8, TB)    bf16/f32  zero-padded observations (transposed)
    w1_ref : (128, 8)   bf16/f32  first-layer weight (out, in_pad)
    b1_ref : (128, 1)   f32
    wh_ref : (8, 128)   bf16/f32  fused head: row0 = w2a[:,0]-w2a[:,1], row2 = w2v
    bh_ref : (8, 1)     f32       fused head bias (row0 = b2a0-b2a1, row2 = b2v)
    out_ref: (8, TB)    f32       sublane 0/1 = log-probs, sublane 2 = value
    """
    # Hidden layer on the MXU with f32 accumulation; bias + ReLU on the VPU.
    h = jnp.dot(w1_ref[...], x_ref[...], preferred_element_type=jnp.float32)
    h = jnp.maximum(h + b1_ref[...], 0.0)                        # (128, TB)

    # Fused head: one (8,128)x(128,TB) MXU dot; row 0 is already a0 - a1.
    heads = jnp.dot(wh_ref[...], h.astype(wh_ref.dtype),
                    preferred_element_type=jnp.float32) + bh_ref[...]   # (8, TB)

    d = heads[0:1, :]                                            # (1, TB) = a0 - a1
    # Closed-form 2-class log_softmax: logp0 = -softplus(-d); logp1 = logp0 - d.
    # (log(1+exp) kept instead of log1p: stays on the verified Mosaic lowering
    #  path; difference is far below the 1e-4 tolerance in f32.)
    logp0 = -(jnp.maximum(-d, 0.0) + jnp.log(1.0 + jnp.exp(-jnp.abs(d))))

    row = jax.lax.broadcasted_iota(jnp.int32, heads.shape, 0)
    # Single lane-dense store: row0 = logp0, row1 = logp1, row2 = value, rest 0.
    out_ref[...] = jnp.where(row == 0, logp0,
                             jnp.where(row == 1, logp0 - d, heads))


def prepare_params(params, use_bf16=True):
    """Fold / pad / cast the raw parameters ONCE (after init or each optimizer
    step). network_forward consumes the result, so the per-step wrapper does no
    weight work at all."""
    w1, b1, w2a, b2a, w2v, b2v = params
    mxu = jnp.bfloat16 if use_bf16 else jnp.float32

    # First layer, transposed + K-padded: (out=128, in_pad=8).
    w1_t = jnp.zeros((_HIDDEN, _K_PAD), jnp.float32).at[:, :4].set(w1.T)
    b1_t = jnp.asarray(b1, jnp.float32).reshape(_HIDDEN, 1)

    # Fused head, transposed: row 0 = action-logit difference, row 2 = value.
    wh_t = jnp.zeros((_OUT_SUB, _HIDDEN), jnp.float32)
    wh_t = wh_t.at[0, :].set(w2a[:, 0] - w2a[:, 1]).at[2, :].set(w2v[:, 0])
    bh_t = jnp.zeros((_OUT_SUB, 1), jnp.float32)
    bh_t = bh_t.at[0, 0].set(b2a[0, 0] - b2a[0, 1]).at[2, 0].set(b2v[0, 0])

    return (w1_t.astype(mxu), b1_t, wh_t.astype(mxu), bh_t)


def _choose_tiling(batch):
    """Return (b_pad, tb); tb is the lane-dim tile width (multiple of 128)."""
    if batch <= 128:
        return 128, 128                        # single tile, grid=(1,)
    if batch <= 2048:
        b_pad = -(-batch // 256) * 256
        return b_pad, b_pad // 2               # even 2-step parallel grid (v7x TCs)
    b_pad = -(-batch // 1024) * 1024
    return b_pad, 1024                         # large rollout batches


def network_forward(x, prepared):
    """x: (B, 4) float32; prepared = prepare_params(params).
    Returns (logproba (B, 2), v (B, 1)) — same semantics as Network.forward."""
    w1_t, b1_t, wh_t, bh_t = prepared
    B = x.shape[0]
    b_pad, tb = _choose_tiling(B)
    grid = (b_pad // tb,)

    # Only per-call data prep: transpose + zero-pad observations to (8, b_pad).
    x_t = jnp.zeros((_K_PAD, b_pad), w1_t.dtype).at[:4, :B].set(
        x.astype(w1_t.dtype).T)

    flops = 2 * b_pad * (_K_PAD * _HIDDEN + _HIDDEN * _OUT_SUB)
    bytes_accessed = (x_t.size * x_t.dtype.itemsize
                      + w1_t.size * w1_t.dtype.itemsize
                      + b1_t.size * 4
                      + wh_t.size * wh_t.dtype.itemsize
                      + bh_t.size * 4
                      + _OUT_SUB * b_pad * 4)

    out = pl.pallas_call(
        _fused_network_kernel,
        out_shape=jax.ShapeDtypeStruct((_OUT_SUB, b_pad), jnp.float32),
        grid=grid,
        in_specs=[
            pl.BlockSpec((_K_PAD, tb), lambda i: (0, i)),
            pl.BlockSpec((_HIDDEN, _K_PAD), lambda i: (0, 0)),
            pl.BlockSpec((_HIDDEN, 1), lambda i: (0, 0)),
            pl.BlockSpec((_OUT_SUB, _HIDDEN), lambda i: (0, 0)),
            pl.BlockSpec((_OUT_SUB, 1), lambda i: (0, 0)),
        ],
        out_specs=pl.BlockSpec((_OUT_SUB, tb), lambda i: (0, i)),
        compiler_params=pltpu.CompilerParams(
            dimension_semantics=("parallel",)),
        cost_estimate=pl.CostEstimate(
            flops=flops, transcendentals=2 * b_pad,   # 1 exp + 1 log per column
            bytes_accessed=bytes_accessed),
    )(x_t, w1_t, b1_t, wh_t, bh_t)

    logp = out[0:2, :B].T    # (B, 2)
    v = out[2:3, :B].T       # (B, 1)
    return logp, v


def init_params(key):
    """PyTorch nn.Linear default init: U[-1/sqrt(fan_in), 1/sqrt(fan_in)]."""
    k1, k2, k3, k4, k5, k6 = jax.random.split(key, 6)

    def uni(k, shape, fan_in):
        bound = 1.0 / jnp.sqrt(fan_in)
        return jax.random.uniform(k, shape, jnp.float32, -bound, bound)

    w1 = uni(k1, (4, 128), 4.0)
    b1 = uni(k2, (1, 128), 4.0)
    w2a = uni(k3, (128, 2), 128.0)
    b2a = uni(k4, (1, 2), 128.0)
    w2v = uni(k5, (128, 1), 128.0)
    b2v = uni(k6, (1, 1), 128.0)
    return (w1, b1, w2a, b2a, w2v, b2v)


def reference_forward_f32(x, params):
    """Pure-f32 JAX re-implementation of the PyTorch module (exact semantics)."""
    w1, b1, w2a, b2a, w2v, b2v = params
    h = jnp.maximum(x @ w1 + b1, 0.0)
    a = h @ w2a + b2a
    v = h @ w2v + b2v
    return jax.nn.log_softmax(a, axis=-1), v


def reference_forward_matched(x, params, use_bf16=True):
    """Pure-JAX reference with the SAME precision/fusion choices as the kernel
    (folded a0-a1 head weight, bf16 MXU operands, f32 accumulation)."""
    w1, b1, w2a, b2a, w2v, b2v = params
    mxu = jnp.bfloat16 if use_bf16 else jnp.float32
    h = jnp.dot(x.astype(mxu), w1.astype(mxu),
                preferred_element_type=jnp.float32) + b1
    h = jnp.maximum(h, 0.0).astype(mxu)
    wd = (w2a[:, 0] - w2a[:, 1]).astype(mxu)[:, None]
    d = jnp.dot(h, wd, preferred_element_type=jnp.float32) + (b2a[0, 0] - b2a[0, 1])
    v = jnp.dot(h, w2v.astype(mxu), preferred_element_type=jnp.float32) + b2v
    logp0 = -jax.nn.softplus(-d)
    return jnp.concatenate([logp0, logp0 - d], axis=-1), v


if __name__ == "__main__":
    key = jax.random.PRNGKey(0)
    pkey, xkey = jax.random.split(key)
    params = init_params(pkey)

    # Hoisted weight prep: done once, NOT inside the per-step forward.
    prepared = prepare_params(params, use_bf16=True)

    # CartPole observation: 4 features; small per-step batch.
    B = 8
    x = jax.random.normal(xkey, (B, 4), jnp.float32)

    fwd = jax.jit(network_forward)
    logp, v = fwd(x, prepared)
    jax.block_until_ready((logp, v))
    assert logp.shape == (B, 2) and v.shape == (B, 1)

    # Precision-matched reference (same fusion/bf16 choices): tight tolerance.
    logp_m, v_m = reference_forward_matched(x, params)
    assert jnp.allclose(logp, logp_m, atol=1e-4, rtol=1e-4), "logproba mismatch"
    assert jnp.allclose(v, v_m, atol=1e-4, rtol=1e-4), "value mismatch"

    # Exact PyTorch-semantics f32 reference: bf16-operand-level tolerance.
    logp_f, v_f = reference_forward_f32(x, params)
    assert jnp.allclose(logp, logp_f, atol=3e-2), "logproba far from f32 reference"
    assert jnp.allclose(v, v_f, atol=3e-2), "value far from f32 reference"

    # Log-probs form a valid distribution.
    assert jnp.allclose(jnp.sum(jnp.exp(logp), axis=-1), 1.0, atol=1e-3)

    # Exercise the multi-tile (even parallel grid) path once as well.
    B2 = 300
    x2 = jax.random.normal(jax.random.PRNGKey(1), (B2, 4), jnp.float32)
    logp2, v2 = jax.jit(network_forward)(x2, prepared)
    jax.block_until_ready((logp2, v2))
    logp2_m, v2_m = reference_forward_matched(x2, params)
    assert jnp.allclose(logp2, logp2_m, atol=1e-4, rtol=1e-4), "batch logproba mismatch"
    assert jnp.allclose(v2, v2_m, atol=1e-4, rtol=1e-4), "batch value mismatch"

    print("KERNEL_OK")
</pallas_src>

<mosaic_0001>
module attributes {stable_mosaic.version = 11 : i64} {
  func.func @_fused_network_kernel(%arg0: i32, %arg1: memref<8x128xbf16, #tpu.memory_space<vmem>>, %arg2: memref<128x8xbf16, #tpu.memory_space<vmem>>, %arg3: memref<128x1xf32, #tpu.memory_space<vmem>>, %arg4: memref<8x128xbf16, #tpu.memory_space<vmem>>, %arg5: memref<8x1xf32, #tpu.memory_space<vmem>>, %arg6: memref<8x128xf32, #tpu.memory_space<vmem>>) attributes {dimension_semantics = [#tpu.dimension_semantics<parallel>], iteration_bounds = array<i64: 1>, scalar_prefetch = 0 : i64, scratch_operands = 0 : i64, tpu.core_type = #tpu.core_type<tc>, window_params = [{transform_indices = @transform_0, window_bounds = array<i64: 8, 128>}, {pipeline_mode = #tpu.pipeline_mode<synchronous>, transform_indices = @transform_1, window_bounds = array<i64: 128, 8>}, {pipeline_mode = #tpu.pipeline_mode<synchronous>, transform_indices = @transform_2, window_bounds = array<i64: 128, 1>}, {pipeline_mode = #tpu.pipeline_mode<synchronous>, transform_indices = @transform_3, window_bounds = array<i64: 8, 128>}, {pipeline_mode = #tpu.pipeline_mode<synchronous>, transform_indices = @transform_4, window_bounds = array<i64: 8, 1>}, {transform_indices = @transform_5, window_bounds = array<i64: 8, 128>}]} {
    %c0 = arith.constant 0 : index
    %c0_0 = arith.constant 0 : index
    %0 = vector.load %arg2[%c0, %c0_0] : memref<128x8xbf16, #tpu.memory_space<vmem>>, vector<128x8xbf16>
    %c0_1 = arith.constant 0 : index
    %c0_2 = arith.constant 0 : index
    %1 = vector.load %arg1[%c0_1, %c0_2] : memref<8x128xbf16, #tpu.memory_space<vmem>>, vector<8x128xbf16>
    %cst = arith.constant dense<0.000000e+00> : vector<128x128xf32>
    %2 = tpu.matmul %0, %1, %cst {dimension_numbers = #tpu.dot_dimension_numbers<[1], [0], [0], [1], [0, 0, 1, 1], [], []>} : vector<128x8xbf16>, vector<8x128xbf16>, vector<128x128xf32> -> vector<128x128xf32>
    %c0_3 = arith.constant 0 : index
    %c0_4 = arith.constant 0 : index
    %3 = vector.load %arg3[%c0_3, %c0_4] : memref<128x1xf32, #tpu.memory_space<vmem>>, vector<128x1xf32>
    %4 = vector.broadcast %3 : vector<128x1xf32> to vector<128x128xf32>
    %5 = arith.addf %2, %4 : vector<128x128xf32>
    %cst_5 = arith.constant 0.000000e+00 : f32
    %6 = vector.broadcast %cst_5 : f32 to vector<128x128xf32>
    %7 = arith.maximumf %5, %6 : vector<128x128xf32>
    %c0_6 = arith.constant 0 : index
    %c0_7 = arith.constant 0 : index
    %8 = vector.load %arg4[%c0_6, %c0_7] : memref<8x128xbf16, #tpu.memory_space<vmem>>, vector<8x128xbf16>
    %9 = arith.truncf %7 : vector<128x128xf32> to vector<128x128xbf16>
    %cst_8 = arith.constant dense<0.000000e+00> : vector<8x128xf32>
    %10 = tpu.matmul %8, %9, %cst_8 {dimension_numbers = #tpu.dot_dimension_numbers<[1], [0], [0], [1], [0, 0, 1, 1], [], []>} : vector<8x128xbf16>, vector<128x128xbf16>, vector<8x128xf32> -> vector<8x128xf32>
    %c0_9 = arith.constant 0 : index
    %c0_10 = arith.constant 0 : index
    %11 = vector.load %arg5[%c0_9, %c0_10] : memref<8x1xf32, #tpu.memory_space<vmem>>, vector<8x1xf32>
    %12 = vector.broadcast %11 : vector<8x1xf32> to vector<8x128xf32>
    %13 = arith.addf %10, %12 : vector<8x128xf32>
    %14 = vector.extract_strided_slice %13 {offsets = [0, 0], sizes = [1, 128], strides = [1, 1]} : vector<8x128xf32> to vector<1x128xf32>
    %cst_11 = arith.constant 0.000000e+00 : f32
    %15 = vector.broadcast %cst_11 : f32 to vector<1x128xf32>
    %16 = arith.subf %15, %14 : vector<1x128xf32>
    %cst_12 = arith.constant 0.000000e+00 : f32
    %17 = vector.broadcast %cst_12 : f32 to vector<1x128xf32>
    %18 = arith.maximumf %16, %17 : vector<1x128xf32>
    %19 = math.absf %14 : vector<1x128xf32>
    %cst_13 = arith.constant 0.000000e+00 : f32
    %20 = vector.broadcast %cst_13 : f32 to vector<1x128xf32>
    %21 = arith.subf %20, %19 : vector<1x128xf32>
    %22 = math.exp %21 : vector<1x128xf32>
    %cst_14 = arith.constant 1.000000e+00 : f32
    %23 = vector.broadcast %cst_14 : f32 to vector<1x128xf32>
    %24 = arith.addf %23, %22 : vector<1x128xf32>
    %25 = math.log %24 : vector<1x128xf32>
    %26 = arith.addf %18, %25 : vector<1x128xf32>
    %cst_15 = arith.constant 0.000000e+00 : f32
    %27 = vector.broadcast %cst_15 : f32 to vector<1x128xf32>
    %28 = arith.subf %27, %26 : vector<1x128xf32>
    %29 = tpu.iota {dimensions = array<i32: 0>} : vector<8x128xi32>
    %c0_i32 = arith.constant 0 : i32
    %30 = vector.broadcast %c0_i32 : i32 to vector<8x128xi32>
    %31 = arith.cmpi eq, %29, %30 : vector<8x128xi32>
    %c1_i32 = arith.constant 1 : i32
    %32 = vector.broadcast %c1_i32 : i32 to vector<8x128xi32>
    %33 = arith.cmpi eq, %29, %32 : vector<8x128xi32>
    %34 = arith.subf %28, %14 : vector<1x128xf32>
    %35 = vector.shape_cast %34 : vector<1x128xf32> to vector<1x128xf32>
    %36 = vector.broadcast %35 : vector<1x128xf32> to vector<8x128xf32>
    %37 = arith.select %33, %36, %13 : vector<8x128xi1>, vector<8x128xf32>
    %38 = vector.shape_cast %28 : vector<1x128xf32> to vector<1x128xf32>
    %39 = vector.broadcast %38 : vector<1x128xf32> to vector<8x128xf32>
    %40 = arith.select %31, %39, %37 : vector<8x128xi1>, vector<8x128xf32>
    %c0_16 = arith.constant 0 : index
    %c0_17 = arith.constant 0 : index
    %41 = vector.load %arg6[%c0_16, %c0_17] : memref<8x128xf32, #tpu.memory_space<vmem>>, vector<8x128xf32>
    tpu.vector_store %arg6[%c0_16, %c0_17], %40 {strides = array<i32>} : memref<8x128xf32, #tpu.memory_space<vmem>>, vector<8x128xf32>,
    return
  }
  func.func @transform_0(%arg0: i32) -> (i32, i32) {
    %c0_i32 = arith.constant 0 : i32
    %c0_i32_0 = arith.constant 0 : i32
    return %c0_i32, %arg0 : i32, i32
  }
  func.func @transform_1(%arg0: i32) -> (i32, i32) {
    %c0_i32 = arith.constant 0 : i32
    %c0_i32_0 = arith.constant 0 : i32
    %c0_i32_1 = arith.constant 0 : i32
    return %c0_i32, %c0_i32_0 : i32, i32
  }
  func.func @transform_2(%arg0: i32) -> (i32, i32) {
    %c0_i32 = arith.constant 0 : i32
    %c0_i32_0 = arith.constant 0 : i32
    %c0_i32_1 = arith.constant 0 : i32
    return %c0_i32, %c0_i32_0 : i32, i32
  }
  func.func @transform_3(%arg0: i32) -> (i32, i32) {
    %c0_i32 = arith.constant 0 : i32
    %c0_i32_0 = arith.constant 0 : i32
    %c0_i32_1 = arith.constant 0 : i32
    return %c0_i32, %c0_i32_0 : i32, i32
  }
  func.func @transform_4(%arg0: i32) -> (i32, i32) {
    %c0_i32 = arith.constant 0 : i32
    %c0_i32_0 = arith.constant 0 : i32
    %c0_i32_1 = arith.constant 0 : i32
    return %c0_i32, %c0_i32_0 : i32, i32
  }
  func.func @transform_5(%arg0: i32) -> (i32, i32) {
    %c0_i32 = arith.constant 0 : i32
    %c0_i32_0 = arith.constant 0 : i32
    return %c0_i32, %arg0 : i32, i32
  }
}

</mosaic_0001>

<bundles_post_ra>
// kernel: network_forward.1
= control target key start
LH: loop header
LB: loop body
LE: loop exit
PB: predicated region body
PF: predicated region fallthrough
CT: control target
= control target key end

     0   :  { %vm199_vm0 = vcmask 1043456   ;;  %v379_v0 = vmov 0   ;;  %vm174_vm1 = vcmask 64512   ;;  %s508_s2 = inlined_call_operand.vmem [shape: f32[128,1], index: 2, kind: input, shape index: {}]   ;;  %s509_s0 = inlined_call_operand.vmem [shape: bf16[8,128], index: 0, kind: input, shape index: {}]   ;;  %s510_s1 = inlined_call_operand.vmem [shape: bf16[128,8], index: 1, kind: input, shape index: {}]   ;;  %s511_s4 = inlined_call_operand.vmem [shape: f32[8,1], index: 4, kind: input, shape index: {}]   ;;  %s512_s3 = inlined_call_operand.vmem [shape: bf16[8,128], index: 3, kind: input, shape index: {}]   ;;  %s513_s5 = inlined_call_operand.vmem [shape: f32[8,128], index: 5, kind: output, shape index: {}]  }
   0x1   :  { %372 = vset.pattern.permute.xlu0 %v379_v0  ;;  %v52_v1 = vld [vmem:[%s508_s2 + $0x70] sm:$0xff]  ;;  %v37_v2 = vld [vmem:[%s509_s0] sm:$0xf]  ;;  %373 = vset.pattern.permute.xlu1 %v379_v0  ;;  %v364_v5 = vld [vmem:[%s510_s1 + $0x18] sm:$0xff] }
   0x2   :  { %126 = vperm.xlu0 %372, %v52_v1   ;;  %v201_v3 = vsel %vm199_vm0, %v37_v2, 0  ;;  %v361_v4 = vld [vmem:[%s510_s1] sm:$0xff]  ;;  %374 = vset.pattern.permute.xlu2 %v379_v0  ;;  %v367_v7 = vld [vmem:[%s510_s1 + $0x30] sm:$0xff]  ;;  %v53_v9 = vld [vmem:[%s508_s2 + $0x78] sm:$0xff] }
   0x3   :  { %v50_v6 = vld [vmem:[%s508_s2 + $0x60] sm:$0xff]  ;;  %210 = vmatpush.bf16.msra.mxu0 %v201_v3  ;;  %369 = vmatpush.bf16.msra.mxu2 %v201_v3  ;;  %v48_v8 = vld [vmem:[%s508_s2 + $0x50] sm:$0xff]  ;;  %v51_v10 = vld [vmem:[%s508_s2 + $0x68] sm:$0xff] }
   0x4   :  { %370 = vmatpush.bf16.msra.mxu3 %v201_v3  ;;  %116 = vperm.xlu1 %373, %v50_v6   ;;  %v49_v11 = vld [vmem:[%s508_s2 + $0x58] sm:$0xff]  ;;  %v46_v12 = vld [vmem:[%s508_s2 + $0x40] sm:$0xff]  ;;  %v47_v13 = vld [vmem:[%s508_s2 + $0x48] sm:$0xff] }
   0x5   :  { %106 = vperm.xlu2 %374, %v48_v8   ;;  %v362_v14 = vld [vmem:[%s510_s1 + $0x8] sm:$0xff]  ;;  %v365_v15 = vld [vmem:[%s510_s1 + $0x20] sm:$0xff]  ;;  %v368_v16 = vld [vmem:[%s510_s1 + $0x38] sm:$0xff] }
   0x6   :  { %353 = vmatmul.msk.bf16.vlgmr.msra.gmra.mxu0 %vm174_vm1, %v361_v4  ;;  %356 = vmatmul.msk.bf16.vlgmr.msra.gmra.mxu2 %vm174_vm1, %v364_v5  ;;  %v44_v17 = vld [vmem:[%s508_s2 + $0x30] sm:$0xff]  ;;  %v45_v18 = vld [vmem:[%s508_s2 + $0x38] sm:$0xff]  ;;  %v42_v19 = vld [vmem:[%s508_s2 + $0x20] sm:$0xff] }
   0x7   :  { %359 = vmatmul.msk.bf16.vlgmr.msra.gmra.mxu3 %vm174_vm1, %v367_v7  ;;  %v43_v20 = vld [vmem:[%s508_s2 + $0x28] sm:$0xff]  ;;  %v40_v21 = vld [vmem:[%s508_s2 + $0x10] sm:$0xff]  ;;  %v41_v22 = vld [vmem:[%s508_s2 + $0x18] sm:$0xff] }
   0x8   :  { %v363_v23 = vld [vmem:[%s510_s1 + $0x10] sm:$0xff]  ;;  %v366_v24 = vld [vmem:[%s510_s1 + $0x28] sm:$0xff]  ;;  %v38_v25 = vld [vmem:[%s508_s2] sm:$0xff] }
   0x9   :  { %v39_v26 = vld [vmem:[%s508_s2 + $0x8] sm:$0xff]  ;;  %v277_v27 = vld [vmem:[%s511_s4] sm:$0xff] }
   0xa   :  { %131 = vperm.xlu0 %372, %v53_v9  }
   0xc   :  { %121 = vperm.xlu1 %373, %v51_v10  }
   0xd   :  { %111 = vperm.xlu2 %374, %v49_v11  }
  0x12   :  { %96 = vperm.xlu0 %372, %v46_v12  }
  0x14   :  { %101 = vperm.xlu1 %373, %v47_v13  }
  0x15   :  { %86 = vperm.xlu2 %374, %v44_v17  }
  0x16   :  { %354 = vmatmul.msk.bf16.gmra.mxu0 %vm174_vm1, %v362_v14  ;;  %357 = vmatmul.msk.bf16.gmra.mxu2 %vm174_vm1, %v365_v15 }
  0x17   :  { %360 = vmatmul.msk.bf16.gmra.mxu3 %vm174_vm1, %v368_v16 }
  0x1a   :  { %91 = vperm.xlu0 %372, %v45_v18  }
  0x1c   :  { %76 = vperm.xlu1 %373, %v42_v19  }
  0x1d   :  { %81 = vperm.xlu2 %374, %v43_v20  }
  0x22   :  { %66 = vperm.xlu0 %372, %v40_v21  }
  0x24   :  { %71 = vperm.xlu1 %373, %v41_v22  }
  0x25   :  { %56 = vperm.xlu2 %374, %v38_v25  }
  0x26   :  { %355 = vmatmul.msk.bf16.gmra.mxu0 %vm174_vm1, %v363_v23  ;;  %358 = vmatmul.msk.bf16.gmra.mxu2 %vm174_vm1, %v366_v24 }
  0x2a   :  { %61 = vperm.xlu0 %372, %v39_v26  }
  0x2c   :  { %280 = vperm.xlu1 %373, %v277_v27  }
  0x5f   :  { %v107_v37 = vpop.permute.xlu2 %106 }
  0x67   :  { %v112_v46 = vpop.permute.xlu2 %111 }
  0x6f   :  { %v87_v60 = vpop.permute.xlu2 %86 }
  0x74   :  { %v127_v31 = vpop.permute.xlu0 %126 }
  0x76   :  { %v117_v35 = vpop.permute.xlu1 %116 }
  0x77   :  { %v82_v10 = vpop.permute.xlu2 %81 }
  0x7c   :  { %v132_v36 = vpop.permute.xlu0 %131 }
  0x7e   :  { %v122_v41 = vpop.permute.xlu1 %121 }
  0x7f   :  { %v57_v26 = vpop.permute.xlu2 %56 }
  0x83   :  { %v496_v28 = vpop.f32.mrf.mxu0 }
  0x84   :  { %v97_v42 = vpop.permute.xlu0 %96 }
  0x86   :  { %v102_v56 = vpop.permute.xlu1 %101 }
  0x89   :  { %v227_v29 = vpop.f32.mrf.mxu2 }
  0x8a   :  { %v242_v30 = vpop.f32.mrf.mxu3  ;;  %v228_v12 = vadd.f32 %v227_v29, %v87_v60 }
  0x8b   :  { %v498_v32 = vpop.f32.mrf.mxu0  ;;  %v243_v47 = vadd.f32 %v242_v30, %v117_v35 }
  0x8c   :  { %v92_v58 = vpop.permute.xlu0 %91  ;;  %v258_v17 = vmax.f32 %v228_v12, 0.0 }
  0x8d   :  { %v264_v53 = vmax.f32 %v243_v47, 0.0 }
  0x8e   :  { %v77_v2 = vpop.permute.xlu1 %76 }
  0x91   :  { %v229_v33 = vpop.f32.mrf.mxu2 }
  0x92   :  { %v244_v34 = vpop.f32.mrf.mxu3  ;;  %v230_v7 = vadd.f32 %v229_v33, %v92_v58  ;;  %v213_v33 = vadd.f32 %v496_v28, %v57_v26 }
  0x93   :  { %v217_v38 = vpop.f32.mrf.mxu0  ;;  %v245_v48 = vadd.f32 %v244_v34, %v122_v41 }
  0x94   :  { %v67_v6 = vpop.permute.xlu0 %66  ;;  %v259_v14 = vmax.f32 %v230_v7, 0.0 }
  0x95   :  { %v265_v54 = vmax.f32 %v245_v48, 0.0  ;;  %v218_v20 = vadd.f32 %v217_v38, %v67_v6  ;;  %v268_v38 = vld [vmem:[%s512_s3] sm:$0xf]  ;;  %v307_v48 = vlaneseq }
  0x96   :  { %v72_v19 = vpop.permute.xlu1 %71  ;;  %v272_v23 = vpack.c.bf16 %v259_v14, %v258_v17 }
  0x97   :  { %v275_v59 = vpack.c.bf16 %v265_v54, %v264_v53  ;;  %v254_v27 = vmax.f32 %v218_v20, 0.0 }
  0x99   :  { %v232_v39 = vpop.f32.mrf.mxu2 }
  0x9a   :  { %v247_v40 = vpop.f32.mrf.mxu3  ;;  %v233_v3 = vadd.f32 %v232_v39, %v97_v42 }
  0x9b   :  { %v248_v43 = vadd.f32 %v247_v40, %v127_v31  ;;  %v219_v49 = vpop.f32.mrf.mxu0 }
  0x9c   :  { %v260_v13 = vmax.f32 %v233_v3, 0.0  ;;  %v220_v21 = vadd.f32 %v219_v49, %v72_v19  ;;  %v62_v24 = vpop.permute.xlu0 %61 }
  0x9d   :  { %v266_v51 = vmax.f32 %v248_v43, 0.0  ;;  %v215_v29 = vadd.f32 %v498_v32, %v62_v24 }
  0x9e   :  { %v255_v30 = vmax.f32 %v220_v21, 0.0  ;;  %v281_v39 = vpop.permute.xlu1 %280 }
  0x9f   :  { %v253_v34 = vmax.f32 %v215_v29, 0.0 }
  0xa0   :  { %v270_v35 = vpack.c.bf16 %v255_v30, %v254_v27 }
  0xa1   :  { %v234_v44 = vpop.f32.mrf.mxu2 }
  0xa2   :  { %v249_v45 = vpop.f32.mrf.mxu3  ;;  %v235_v0 = vadd.f32 %v234_v44, %v102_v56 }
  0xa3   :  { %v250_v50 = vadd.f32 %v249_v45, %v132_v36  ;;  %v222_v61 = vpop.f32.mrf.mxu0  ;;  %v252_v36 = vmax.f32 %v213_v33, 0.0 }
  0xa4   :  { %v261_v8 = vmax.f32 %v235_v0, 0.0  ;;  %v223_v18 = vadd.f32 %v222_v61, %v77_v2 }
  0xa5   :  { %v267_v52 = vmax.f32 %v250_v50, 0.0 }
  0xa6   :  { %v273_v16 = vpack.c.bf16 %v261_v8, %v260_v13  ;;  %v256_v25 = vmax.f32 %v223_v18, 0.0 }
  0xa7   :  { %v276_v55 = vpack.c.bf16 %v267_v52, %v266_v51  ;;  %v308_v52 = vshrl.u32 %v307_v48, 7 }
  0xa9   :  { %283 = vmatpush.bf16.msra.mxu1 %v276_v55  ;;  %v237_v57 = vpop.f32.mrf.mxu2  ;;  %vm310_vm2 = vcmp.eq.s32.totalorder %v308_v52, 1  ;;  %vm309_vm3 = vcmp.eq.s32.totalorder %v308_v52, 0 }
  0xaa   :  { %v238_v62 = vadd.f32 %v237_v57, %v107_v37  ;;  %v269_v37 = vpack.c.bf16 %v253_v34, %v252_v36 }
  0xab   :  { %v224_v11 = vpop.f32.mrf.mxu0 }
  0xac   :  { %v262_v4 = vmax.f32 %v238_v62, 0.0  ;;  %v225_v15 = vadd.f32 %v224_v11, %v82_v10 }
  0xad   :  { %284 = vmatpush.bf16.msra.mxu1 %v275_v59 }
  0xae   :  { %v257_v22 = vmax.f32 %v225_v15, 0.0 }
  0xb0   :  { %v271_v31 = vpack.c.bf16 %v257_v22, %v256_v25 }
  0xb1   :  { %v239_v63 = vpop.f32.mrf.mxu2 }
  0xb2   :  { %v240_v1 = vadd.f32 %v239_v63, %v112_v46 }
  0xb4   :  { %v263_v5 = vmax.f32 %v240_v1, 0.0 }
  0xb6   :  { %v274_v9 = vpack.c.bf16 %v263_v5, %v262_v4 }
  0xb8   :  { %285 = vmatpush.bf16.msra.mxu1 %v274_v9 }
  0xbc   :  { %286 = vmatpush.bf16.msra.mxu1 %v273_v16 }
  0xc0   :  { %287 = vmatpush.bf16.msra.mxu1 %v272_v23 }
  0xc4   :  { %288 = vmatpush.bf16.msra.mxu1 %v271_v31 }
  0xc8   :  { %289 = vmatpush.bf16.msra.mxu1 %v270_v35 }
  0xcc   :  { %290 = vmatpush.bf16.msra.mxu1 %v269_v37 }
  0xcf   :  { %291 = vmatmul.bf16.vlgmr.msra.gmra.mxu1 %v268_v38 }
 0x14c   :  { %v292_v40 = vpop.f32.mrf.mxu1 }
 0x14d   :  { %v293_v41 = vadd.f32 %v292_v40, %v281_v39 }
 0x14f   :  { %v298_v42 = vand.u32 2147483647, %v293_v41  ;;  %v296_v46 = vsub.f32 0.0, %v293_v41 }
 0x151   :  { %v299_v32 = vsub.f32 0.0, %v298_v42  ;;  %v297_v49 = vmax.f32 %v296_v46, 0.0 }
 0x153   :  { %v300_v43 = vmul.f32 1.442695, %v299_v32 }
 0x154   :  { %v294_v44 = vpop.f32.mrf.mxu1 }
 0x155   :  { %375 = vpow2.f32 %v300_v43 }
 0x15b   :  { %v376_v28 = vpop.eup %375 }
 0x15c   :  { %v302_v45 = vadd.f32 1.0, %v376_v28 }
 0x15e   :  { %377 = vlog2.f32 %v302_v45 }
 0x164   :  { %v378_v47 = vpop.eup %377 }
 0x165   :  { %v304_v50 = vmul.f32 0.6931472, %v378_v47 }
 0x167   :  { %v305_v51 = vadd.f32 %v304_v50, %v297_v49 }
 0x169   :  { %v306_v53 = vsub.f32 0.0, %v305_v51 }
 0x16b   :  { %v311_v54 = vsub.f32 %v306_v53, %v293_v41  ;;  %v314_v56 = vperm.slane %v306_v53, 0 }
 0x16d   :  { %v312_v55 = vperm.slane %v311_v54, 0 }
 0x16f   :  { %v313_v57 = vsel %vm310_vm2, %v312_v55, %v293_v41 }
 0x170   :  { %v315_v58 = vsel %vm309_vm3, %v314_v56, %v313_v57 }
 0x171   :  { %316 = vst [vmem:[%s513_s5] sm:$0xff] %v315_v58 }

</bundles_post_ra>
